<compile_context>
chip_gen: v7x
topology: tpu7x:2x2x1
jax: 0.10.0
libtpu: 0.0.40
codegen_flags: <defaults>
</compile_context>

<pallas_src>
import functools

import jax
import jax.numpy as jnp
from jax.experimental import pallas as pl
from jax.experimental.pallas import tpu as pltpu


# ---------------------------------------------------------------------------
# small helpers
# ---------------------------------------------------------------------------

def _cdiv(a, b):
    return -(-a // b)


def _round_up(x, m):
    return ((x + m - 1) // m) * m


def _min_sublane(dtype):
    # minimum sublane tile: 8 rows for f32, 16 for bf16, 32 for int8/fp8
    return max(8, 32 // jnp.dtype(dtype).itemsize)


def _vmem_capacity():
    try:
        cap = int(getattr(pltpu.get_tpu_info(), "vmem_capacity_bytes", 0))
        if cap > 0:
            return cap
    except Exception:
        pass
    return 64 << 20                      # conservative default (v7x per-core VMEM)


def _vmem_limit(bytes_needed, vmem_cap):
    limit = max(bytes_needed + (8 << 20), 32 << 20)   # headroom for Mosaic scratch
    return int(min(limit, vmem_cap - (8 << 20)))


def _pad_cols(a, mult):
    pad = _round_up(a.shape[-1], mult) - a.shape[-1]
    if pad == 0:
        return a
    widths = [(0, 0)] * a.ndim
    widths[-1] = (0, pad)
    return jnp.pad(a, widths)


def _pad_rows(a, mult):
    pad = _round_up(a.shape[0], mult) - a.shape[0]
    if pad == 0:
        return a
    widths = [(0, 0)] * a.ndim
    widths[0] = (0, pad)
    return jnp.pad(a, widths)


def _pick_tm(batch, bytes_per_row, fixed_bytes, budget, min_rows, tm_cap):
    """Largest batch tile (multiple of min_rows, <= tm_cap) whose streamed
    tiles fit `budget` next to `fixed_bytes` of resident data; splits to at
    least two grid steps when possible so both v7x TensorCores get work."""
    if batch <= min_rows:
        return batch                                 # whole-dim block, always legal
    tm = min(_round_up(batch, min_rows), tm_cap)
    while tm > min_rows and fixed_bytes + tm * bytes_per_row > budget:
        new_tm = max(min_rows, _round_up(tm // 2, min_rows))
        if new_tm == tm:
            break
        tm = new_tm
    if tm >= batch:                                  # single step -> split (megacore)
        tm = max(min_rows, _round_up(_cdiv(batch, 2), min_rows))
    return tm


def _pick_k_tile(d_in):
    for t in (512, 256, 128):
        if d_in % t == 0:
            return t
    return d_in                                      # single (full) K block


# ---------------------------------------------------------------------------
# kernels
# ---------------------------------------------------------------------------

def _linear_simple_kernel(x_ref, w_ref, b_ref, o_ref, *, activation):
    # out = act(x @ W + b) in one shot: no accumulator scratch, no K axis.
    out = jnp.dot(x_ref[...], w_ref[...], preferred_element_type=jnp.float32)
    out = out + b_ref[...].astype(jnp.float32)
    if activation == "relu":
        out = jnp.maximum(out, 0.0)
    o_ref[...] = out.astype(o_ref.dtype)


def _linear_acc_kernel(x_ref, w_ref, b_ref, o_ref, acc_ref, *, activation):
    # grid = (B/tm, N/tn, K/tk); K is the last ("arbitrary") axis.
    k = pl.program_id(2)
    part = jnp.dot(x_ref[...], w_ref[...], preferred_element_type=jnp.float32)

    @pl.when(k == 0)
    def _():
        acc_ref[...] = part                          # direct assign: no zero-init store

    @pl.when(k != 0)
    def _():
        acc_ref[...] = acc_ref[...] + part

    @pl.when(k == pl.num_programs(2) - 1)
    def _():
        out = acc_ref[...] + b_ref[...].astype(jnp.float32)
        if activation == "relu":
            out = jnp.maximum(out, 0.0)
        o_ref[...] = out.astype(o_ref.dtype)


def _mlp_fused_kernel(x_ref, w1_ref, b1_ref, w2_ref, b2_ref, o_ref):
    # Both weights resident in VMEM; hidden activation never touches HBM.
    h = jnp.dot(x_ref[...], w1_ref[...], preferred_element_type=jnp.float32)
    h = jnp.maximum(h + b1_ref[...].astype(jnp.float32), 0.0)
    out = jnp.dot(h.astype(w2_ref.dtype), w2_ref[...],
                  preferred_element_type=jnp.float32)
    out = out + b2_ref[...].astype(jnp.float32)
    o_ref[...] = out.astype(o_ref.dtype)


def _padding_kernel(x_ref, pad_ref, o_ref):
    # out = concat([x, broadcast(padding_values)], axis=1)
    rows, d_in = x_ref.shape
    p = pad_ref.shape[1]
    o_ref[:, :d_in] = x_ref[...]
    o_ref[:, d_in:] = jnp.broadcast_to(pad_ref[...], (rows, p)).astype(o_ref.dtype)


# ---------------------------------------------------------------------------
# pallas_call wrappers
# ---------------------------------------------------------------------------

def pallas_linear(x, w, b, activation=None, compute_dtype=None):
    """out = act(x @ W + b).  Resident-weight 1-D grid when W fits ~VMEM/4,
    otherwise a tiled (B, N, K) grid with an f32 accumulator."""
    out_dtype = x.dtype
    B, Din = x.shape
    Dout = w.shape[1]

    cd = jnp.dtype(compute_dtype) if compute_dtype is not None else jnp.dtype(x.dtype)
    if cd != x.dtype:
        x = x.astype(cd)
    if cd != w.dtype:
        w = w.astype(cd)

    it = cd.itemsize
    out_it = jnp.dtype(out_dtype).itemsize
    min_rows = _min_sublane(cd)
    vmem_cap = _vmem_capacity()
    budget = int(vmem_cap * 0.7)
    tm_cap = 1024 if vmem_cap >= (128 << 20) else 512
    resident_budget = vmem_cap // 4                  # ~16 MiB v7x, ~32 MiB v5e/v6e
    w_bytes = Din * Dout * it + 2 * Dout * jnp.dtype(b.dtype).itemsize

    # ---- fast path: resident weight, 1-D grid over batch -------------------
    if w_bytes <= resident_budget:
        per_row = 2 * (Din * it + Dout * out_it)     # double-buffered x / out rows
        tm = _pick_tm(B, per_row, w_bytes, budget, min_rows, tm_cap)
        grid = (_cdiv(B, tm),)
        return pl.pallas_call(
            functools.partial(_linear_simple_kernel, activation=activation),
            out_shape=jax.ShapeDtypeStruct((B, Dout), out_dtype),
            grid_spec=pltpu.PrefetchScalarGridSpec(
                num_scalar_prefetch=0, grid=grid,
                in_specs=[pl.BlockSpec((tm, Din), lambda i: (i, 0)),
                          pl.BlockSpec((Din, Dout), lambda i: (0, 0)),
                          pl.BlockSpec((1, Dout), lambda i: (0, 0))],
                out_specs=pl.BlockSpec((tm, Dout), lambda i: (i, 0))),
            compiler_params=pltpu.CompilerParams(
                dimension_semantics=("parallel",),
                vmem_limit_bytes=_vmem_limit(w_bytes + tm * per_row, vmem_cap)),
        )(x, w, b)

    # ---- tiled fallback (weights too large to keep resident) ---------------
    tk = _pick_k_tile(Din)
    if tk == Din and Din % 128 != 0 and Din > 4096:
        # huge ragged K: zero-pad so K can be tiled without partial blocks
        x = _pad_cols(x, 128)
        w = _pad_rows(w, 128)
        Din = x.shape[1]
        tk = _pick_k_tile(Din)
    k_steps = Din // tk

    def tile_bytes(tm, tn):
        byt = 2 * (tm * tk * it + tk * tn * it + tn * 4)   # x, w, bias (dbl buf)
        byt += 2 * tm * tn * out_it                        # out (dbl buf)
        if k_steps > 1:
            byt += tm * tn * 4                             # f32 accumulator
        return byt

    tm_opts = sorted({t for t in (1024, 512, 256, 128, 64, 32, 16, 8)
                      if min_rows <= t <= tm_cap}, reverse=True)
    tm = tn = None
    # prefer tn == Dout: x streamed exactly once, no lane padding, no slice
    for tm_c in tm_opts:
        if tile_bytes(tm_c, Dout) <= budget:
            tm, tn = tm_c, Dout
            break
    if tm is None:                                   # last resort: tile N (lane-padded)
        w = _pad_cols(w, 128)
        b = _pad_cols(b, 128)
        Dpad = w.shape[1]
        for tn_c in (512, 256, 128):
            if Dpad % tn_c:
                continue
            for tm_c in tm_opts:
                if tile_bytes(tm_c, tn_c) <= budget:
                    tm, tn = tm_c, tn_c
                    break
            if tm is not None:
                break
        if tm is None:
            tm, tn = min_rows, 128

    n_total = w.shape[1]
    gn = n_total // tn
    gb = _cdiv(B, tm)
    if gb * gn < 2 and B > min_rows:                 # keep both v7x TCs busy
        tm = max(min_rows, _round_up(_cdiv(B, 2), min_rows))
        gb = _cdiv(B, tm)

    vmem_limit = _vmem_limit(tile_bytes(tm, tn), vmem_cap)
    if k_steps == 1:
        out = pl.pallas_call(
            functools.partial(_linear_simple_kernel, activation=activation),
            out_shape=jax.ShapeDtypeStruct((B, n_total), out_dtype),
            grid_spec=pltpu.PrefetchScalarGridSpec(
                num_scalar_prefetch=0, grid=(gb, gn),
                in_specs=[pl.BlockSpec((tm, Din), lambda i, j: (i, 0)),
                          pl.BlockSpec((Din, tn), lambda i, j: (0, j)),
                          pl.BlockSpec((1, tn), lambda i, j: (0, j))],
                out_specs=pl.BlockSpec((tm, tn), lambda i, j: (i, j))),
            compiler_params=pltpu.CompilerParams(
                dimension_semantics=("parallel", "parallel"),
                vmem_limit_bytes=vmem_limit),
        )(x, w, b)
    else:
        out = pl.pallas_call(
            functools.partial(_linear_acc_kernel, activation=activation),
            out_shape=jax.ShapeDtypeStruct((B, n_total), out_dtype),
            grid_spec=pltpu.PrefetchScalarGridSpec(
                num_scalar_prefetch=0, grid=(gb, gn, k_steps),
                in_specs=[pl.BlockSpec((tm, tk), lambda i, j, k: (i, k)),
                          pl.BlockSpec((tk, tn), lambda i, j, k: (k, j)),
                          pl.BlockSpec((1, tn), lambda i, j, k: (0, j))],
                out_specs=pl.BlockSpec((tm, tn), lambda i, j, k: (i, j)),
                scratch_shapes=[pltpu.VMEM((tm, tn), jnp.float32)]),
            compiler_params=pltpu.CompilerParams(
                dimension_semantics=("parallel", "parallel", "arbitrary"),
                vmem_limit_bytes=vmem_limit),
        )(x, w, b)

    if n_total != Dout:
        out = out[:, :Dout]
    return out


def pallas_mlp(x, w1, b1, w2, b2, compute_dtype=None):
    """out = relu(x @ W1 + b1) @ W2 + b2, fused into one kernel when both
    weight matrices fit ~VMEM/4 (the hidden activation never touches HBM)."""
    out_dtype = x.dtype
    B, Din = x.shape
    H = w1.shape[1]
    Dout = w2.shape[1]

    cd = jnp.dtype(compute_dtype) if compute_dtype is not None else jnp.dtype(x.dtype)
    it = cd.itemsize
    out_it = jnp.dtype(out_dtype).itemsize
    min_rows = _min_sublane(cd)
    vmem_cap = _vmem_capacity()
    budget = int(vmem_cap * 0.7)
    tm_cap = 1024 if vmem_cap >= (128 << 20) else 512
    resident_budget = vmem_cap // 4

    Hp = _round_up(H, 128)      # lane-dense hidden (exact: zero-padded W1/b1/W2)
    w_bytes = (Din * Hp + Hp * Dout) * it + 2 * (Hp + Dout) * 4

    if w_bytes <= resident_budget:
        xc = x.astype(cd) if cd != x.dtype else x
        w1c = w1.astype(cd) if cd != w1.dtype else w1
        w2c = w2.astype(cd) if cd != w2.dtype else w2
        b1c, b2c = b1, b2
        if Hp != H:
            w1c = _pad_cols(w1c, 128)
            b1c = _pad_cols(b1c, 128)
            w2c = _pad_rows(w2c, 128)
        per_row = 2 * (Din * it + Dout * out_it) + Hp * (4 + it)
        tm = _pick_tm(B, per_row, w_bytes, budget, min_rows, tm_cap)
        grid = (_cdiv(B, tm),)
        return pl.pallas_call(
            _mlp_fused_kernel,
            out_shape=jax.ShapeDtypeStruct((B, Dout), out_dtype),
            grid_spec=pltpu.PrefetchScalarGridSpec(
                num_scalar_prefetch=0, grid=grid,
                in_specs=[pl.BlockSpec((tm, Din), lambda i: (i, 0)),
                          pl.BlockSpec((Din, Hp), lambda i: (0, 0)),
                          pl.BlockSpec((1, Hp), lambda i: (0, 0)),
                          pl.BlockSpec((Hp, Dout), lambda i: (0, 0)),
                          pl.BlockSpec((1, Dout), lambda i: (0, 0))],
                out_specs=pl.BlockSpec((tm, Dout), lambda i: (i, 0))),
            compiler_params=pltpu.CompilerParams(
                dimension_semantics=("parallel",),
                vmem_limit_bytes=_vmem_limit(w_bytes + tm * per_row, vmem_cap)),
        )(xc, w1c, b1c, w2c, b2c)

    # TODO(synk): for the rare >VMEM/4 weight case the hidden activation still
    # makes one HBM round trip between the two tiled linear calls.
    h = pallas_linear(x, w1, b1, activation="relu", compute_dtype=compute_dtype)
    return pallas_linear(h, w2, b2, compute_dtype=compute_dtype)


def pallas_padding(x, pad_vals):
    """out = concat([x, broadcast(padding_values)], axis=1) — pure mem-bound copy."""
    B, Din = x.shape
    P = pad_vals.shape[1]
    Dout = Din + P
    it = jnp.dtype(x.dtype).itemsize

    if Din % 128 != 0 and Dout > 512:
        # Lane-misaligned split stores are the slow path on TPU; for wide rows
        # the plain XLA concat of this mem-bound copy is the better choice.
        # TODO(synk): a lane-realigning Pallas variant could avoid this fallback.
        return jnp.concatenate(
            [x, jnp.broadcast_to(pad_vals.astype(x.dtype), (B, P))], axis=1)

    min_rows = _min_sublane(x.dtype)
    vmem_cap = _vmem_capacity()
    budget = int(vmem_cap * 0.7)
    tm_cap = 1024 if vmem_cap >= (128 << 20) else 512
    per_row = 2 * (Din + Dout) * it                  # double-buffered in/out rows
    fixed = 2 * P * jnp.dtype(pad_vals.dtype).itemsize
    tm = _pick_tm(B, per_row, fixed, budget, min_rows, tm_cap)
    grid = (_cdiv(B, tm),)
    return pl.pallas_call(
        _padding_kernel,
        out_shape=jax.ShapeDtypeStruct((B, Dout), x.dtype),
        grid_spec=pltpu.PrefetchScalarGridSpec(
            num_scalar_prefetch=0, grid=grid,
            in_specs=[pl.BlockSpec((tm, Din), lambda i: (i, 0)),
                      pl.BlockSpec((1, P), lambda i: (0, 0))],
            out_specs=pl.BlockSpec((tm, Dout), lambda i: (i, 0))),
        compiler_params=pltpu.CompilerParams(
            dimension_semantics=("parallel",),
            vmem_limit_bytes=_vmem_limit(fixed + tm * per_row, vmem_cap)),
    )(x, pad_vals)


# ---------------------------------------------------------------------------
# FeatureAdapter: parameter init + forward dispatch (glue in plain JAX)
# ---------------------------------------------------------------------------

def _he_linear(key, d_in, d_out, dtype=jnp.float32):
    # kaiming_normal_(mode='fan_in', nonlinearity='relu'): std = sqrt(2 / fan_in)
    std = (2.0 / d_in) ** 0.5
    w = (std * jax.random.normal(key, (d_in, d_out), jnp.float32)).astype(dtype)
    b = jnp.zeros((1, d_out), dtype)
    return w, b


class FeatureAdapter:
    """JAX/Pallas port of the PyTorch FeatureAdapter forward pass."""

    def __init__(self, input_dim, target_dim, strategy="linear",
                 key=None, dtype=jnp.float32, compute_dtype=None):
        if key is None:
            key = jax.random.PRNGKey(0)
        self.input_dim = input_dim
        self.target_dim = target_dim
        self.strategy = strategy
        self.dtype = dtype
        # None keeps PyTorch f32 numerics; jnp.bfloat16 enables the bf16 MXU
        # path (f32 accumulate) for much higher matmul throughput on v6e/v7x.
        self.compute_dtype = compute_dtype
        k1, k2 = jax.random.split(key)

        if input_dim == target_dim:
            self.params = {}
        elif input_dim > target_dim:
            if strategy == "linear":
                w, b = _he_linear(k1, input_dim, target_dim, dtype)
                self.params = {"w": w, "b": b}
            elif strategy == "mlp":
                hidden = (input_dim + target_dim) // 2
                w1, b1 = _he_linear(k1, input_dim, hidden, dtype)
                w2, b2 = _he_linear(k2, hidden, target_dim, dtype)
                self.params = {"w1": w1, "b1": b1, "w2": w2, "b2": b2}
            elif strategy == "selection":
                self.params = {"feature_importance": jnp.ones((input_dim,), dtype)}
            else:
                raise ValueError(f"Unknown strategy: {strategy}")
        else:
            if strategy == "linear":
                w, b = _he_linear(k1, input_dim, target_dim, dtype)
                self.params = {"w": w, "b": b}
            elif strategy == "mlp":
                hidden = (input_dim + target_dim) // 2
                w1, b1 = _he_linear(k1, input_dim, hidden, dtype)
                w2, b2 = _he_linear(k2, hidden, target_dim, dtype)
                self.params = {"w1": w1, "b1": b1, "w2": w2, "b2": b2}
            elif strategy == "padding":
                self.params = {"padding_values":
                               jnp.zeros((1, target_dim - input_dim), dtype)}
            else:
                raise ValueError(f"Unknown strategy: {strategy}")

    def __call__(self, x):
        if self.input_dim == self.target_dim:
            return x
        if self.input_dim > self.target_dim:
            if self.strategy == "selection":
                # TODO(synk): softmax/top_k/sort + lane-axis column gather has
                # no clean Pallas equivalent; done in plain JAX (XLA gather).
                imp = jax.nn.softmax(self.params["feature_importance"], axis=0)
                _, idx = jax.lax.top_k(imp, self.target_dim)
                idx = jnp.sort(idx)
                return jnp.take(x, idx, axis=1)
            if self.strategy == "linear":
                return pallas_linear(x, self.params["w"], self.params["b"],
                                     compute_dtype=self.compute_dtype)
            return pallas_mlp(x, self.params["w1"], self.params["b1"],
                              self.params["w2"], self.params["b2"],
                              compute_dtype=self.compute_dtype)
        if self.strategy == "padding":
            return pallas_padding(x, self.params["padding_values"])
        if self.strategy == "linear":
            return pallas_linear(x, self.params["w"], self.params["b"],
                                 compute_dtype=self.compute_dtype)
        return pallas_mlp(x, self.params["w1"], self.params["b1"],
                          self.params["w2"], self.params["b2"],
                          compute_dtype=self.compute_dtype)


# ---------------------------------------------------------------------------
# Demo / smoke test
# ---------------------------------------------------------------------------

if __name__ == "__main__":
    key = jax.random.PRNGKey(0)
    kx, kp, kb = jax.random.split(key, 3)

    batch, input_dim, target_dim = 8, 32, 16
    x = jax.random.normal(kx, (batch, input_dim), jnp.float32)

    # reduction / linear  (resident-weight fast path)
    lin = FeatureAdapter(input_dim, target_dim, strategy="linear", key=kp)
    y_lin = jax.block_until_ready(lin(x))
    assert y_lin.shape == (batch, target_dim)
    ref_lin = x @ lin.params["w"] + lin.params["b"]
    assert jnp.allclose(y_lin, ref_lin, atol=1e-4)

    # reduction / mlp  (fused resident two-matmul kernel, hidden stays in VMEM)
    mlp = FeatureAdapter(input_dim, target_dim, strategy="mlp", key=kp)
    y_mlp = jax.block_until_ready(mlp(x))
    assert y_mlp.shape == (batch, target_dim)
    h_ref = jnp.maximum(x @ mlp.params["w1"] + mlp.params["b1"], 0.0)
    ref_mlp = h_ref @ mlp.params["w2"] + mlp.params["b2"]
    assert jnp.allclose(y_mlp, ref_mlp, atol=1e-4)

    # reduction / selection (plain JAX gather; no clean Pallas equivalent)
    sel = FeatureAdapter(input_dim, target_dim, strategy="selection", key=kp)
    y_sel = jax.block_until_ready(sel(x))
    assert y_sel.shape == (batch, target_dim)

    # expansion / padding
    x_small = jax.random.normal(kx, (batch, target_dim), jnp.float32)
    pad = FeatureAdapter(target_dim, input_dim, strategy="padding", key=kp)
    y_pad = jax.block_until_ready(pad(x_small))
    assert y_pad.shape == (batch, input_dim)
    assert jnp.allclose(y_pad[:, :target_dim], x_small)
    assert jnp.allclose(y_pad[:, target_dim:], 0.0)

    # expansion / linear
    exp_lin = FeatureAdapter(target_dim, input_dim, strategy="linear", key=kp)
    y_exp = jax.block_until_ready(exp_lin(x_small))
    assert y_exp.shape == (batch, input_dim)
    ref_exp = x_small @ exp_lin.params["w"] + exp_lin.params["b"]
    assert jnp.allclose(y_exp, ref_exp, atol=1e-4)

    # identity
    ident = FeatureAdapter(input_dim, input_dim, key=kp)
    assert jnp.allclose(ident(x), x)

    # larger batch: exercises the multi-step parallel grid (both v7x TCs busy)
    xb = jax.random.normal(kb, (64, input_dim), jnp.float32)
    y_big = jax.block_until_ready(lin(xb))
    ref_big = xb @ lin.params["w"] + lin.params["b"]
    assert jnp.allclose(y_big, ref_big, atol=1e-4)

    # opt-in bf16 MXU path (f32 accumulate) — looser tolerance vs f32 reference
    lin_bf16 = FeatureAdapter(input_dim, target_dim, strategy="linear",
                              key=kp, compute_dtype=jnp.bfloat16)
    y_bf16 = jax.block_until_ready(lin_bf16(x))
    assert y_bf16.dtype == jnp.float32
    assert jnp.allclose(y_bf16, ref_lin, atol=1e-1)

    print("KERNEL_OK")
</pallas_src>

<mosaic_0001>
module attributes {stable_mosaic.version = 11 : i64} {
  func.func @_linear_simple_kernel(%arg0: i32, %arg1: memref<8x32xf32, #tpu.memory_space<vmem>>, %arg2: memref<32x16xf32, #tpu.memory_space<vmem>>, %arg3: memref<1x16xf32, #tpu.memory_space<vmem>>, %arg4: memref<8x16xf32, #tpu.memory_space<vmem>>) attributes {dimension_semantics = [#tpu.dimension_semantics<parallel>], iteration_bounds = array<i64: 1>, scalar_prefetch = 0 : i64, scratch_operands = 0 : i64, tpu.core_type = #tpu.core_type<tc>, window_params = [{transform_indices = @transform_0, window_bounds = array<i64: 8, 32>}, {pipeline_mode = #tpu.pipeline_mode<synchronous>, transform_indices = @transform_1, window_bounds = array<i64: 32, 16>}, {pipeline_mode = #tpu.pipeline_mode<synchronous>, transform_indices = @transform_2, window_bounds = array<i64: 1, 16>}, {transform_indices = @transform_3, window_bounds = array<i64: 8, 16>}]} {
    %c0 = arith.constant 0 : index
    %c0_0 = arith.constant 0 : index
    %0 = vector.load %arg1[%c0, %c0_0] : memref<8x32xf32, #tpu.memory_space<vmem>>, vector<8x32xf32>
    %c0_1 = arith.constant 0 : index
    %c0_2 = arith.constant 0 : index
    %1 = vector.load %arg2[%c0_1, %c0_2] : memref<32x16xf32, #tpu.memory_space<vmem>>, vector<32x16xf32>
    %cst = arith.constant dense<0.000000e+00> : vector<8x16xf32>
    %2 = tpu.matmul %0, %1, %cst {dimension_numbers = #tpu.dot_dimension_numbers<[1], [0], [0], [1], [0, 0, 1, 1], [], []>} : vector<8x32xf32>, vector<32x16xf32>, vector<8x16xf32> -> vector<8x16xf32>
    %c0_3 = arith.constant 0 : index
    %c0_4 = arith.constant 0 : index
    %3 = vector.load %arg3[%c0_3, %c0_4] : memref<1x16xf32, #tpu.memory_space<vmem>>, vector<1x16xf32>
    %4 = vector.broadcast %3 : vector<1x16xf32> to vector<8x16xf32>
    %5 = arith.addf %2, %4 : vector<8x16xf32>
    %c0_5 = arith.constant 0 : index
    %c0_6 = arith.constant 0 : index
    %6 = vector.load %arg4[%c0_5, %c0_6] : memref<8x16xf32, #tpu.memory_space<vmem>>, vector<8x16xf32>
    tpu.vector_store %arg4[%c0_5, %c0_6], %5 {strides = array<i32>} : memref<8x16xf32, #tpu.memory_space<vmem>>, vector<8x16xf32>,
    return
  }
  func.func @transform_0(%arg0: i32) -> (i32, i32) {
    %c0_i32 = arith.constant 0 : i32
    %c0_i32_0 = arith.constant 0 : i32
    return %arg0, %c0_i32 : i32, i32
  }
  func.func @transform_1(%arg0: i32) -> (i32, i32) {
    %c0_i32 = arith.constant 0 : i32
    %c0_i32_0 = arith.constant 0 : i32
    %c0_i32_1 = arith.constant 0 : i32
    return %c0_i32, %c0_i32_0 : i32, i32
  }
  func.func @transform_2(%arg0: i32) -> (i32, i32) {
    %c0_i32 = arith.constant 0 : i32
    %c0_i32_0 = arith.constant 0 : i32
    %c0_i32_1 = arith.constant 0 : i32
    return %c0_i32, %c0_i32_0 : i32, i32
  }
  func.func @transform_3(%arg0: i32) -> (i32, i32) {
    %c0_i32 = arith.constant 0 : i32
    %c0_i32_0 = arith.constant 0 : i32
    return %arg0, %c0_i32 : i32, i32
  }
}

</mosaic_0001>

<bundles_post_ra>
// kernel: tpu_custom_call.1
= control target key start
LH: loop header
LB: loop body
LE: loop exit
PB: predicated region body
PF: predicated region fallthrough
CT: control target
= control target key end

     0   :  { %v169_v3 = vmov 0.0|0.0   ;;  %vm170_vm0 = vmmov 0   ;;  %v171_v6 = vmov 0.0   ;;  %s223_s0 = inlined_call_operand.vmem [shape: f32[8,32], index: 0, kind: input, shape index: {}]   ;;  %s224_s1 = inlined_call_operand.vmem [shape: f32[32,16], index: 1, kind: input, shape index: {}]   ;;  %s225_s2 = inlined_call_operand.vmem [shape: f32[1,16], index: 2, kind: input, shape index: {}]   ;;  %s226_s3 = inlined_call_operand.hbm [shape: f32[8,16], index: 3, kind: output, shape index: {}]  }
   0x1   :  { %v16_v0 = vld [vmem:[%s224_s1] sm:$0xff]  ;;  %v17_v1 = vld [vmem:[%s224_s1 + $0x8] sm:$0xff]  ;;  %v18_v2 = vld [vmem:[%s224_s1 + $0x10] sm:$0xff]  ;;  %135 = vmatprep.subr.bf16.mxu0 %v169_v3  ;;  %132 = vmatprep.mubr.msk.f32.mxu0 %vm170_vm0, %v171_v6 }
   0x2   :  { %v136_v4 = vpack.c.bf16 %v17_v1, %v16_v0  ;;  %v19_v5 = vld [vmem:[%s224_s1 + $0x18] sm:$0xff] }
   0x3   :  { %8 = vsyncpa [#allocation3], 0  ;;  %v139_v7 = vpack.c.bf16 %v19_v5, %v18_v2  ;;  %v15_v8 = vld [vmem:[%s223_s0] sm:$0xff]  ;;  %vm27_vm1 = vcmask 261120   ;;  %s172_s24 = smov [#allocation2]   ;;  %vm101_vm2 = vcmask 130048  }
   0x4   :  { %137 = vmatpush3.bf16.msra.mxu0 %v136_v4  ;;  %v117_v9 = vld [vmem:[%s225_s2] ss:$0 sm:$0xff]  ;;  %s109_s1 = sshll.u32 %s172_s24, 4  ;;  %s110_s1 = int_to_ptr.vmem [resolvable:$true] %s109_s1 }
   0x5   :  { %138 = vmatprep.subr.bf16.mxu0 %v169_v3  ;;  %s145_s25 = scalar_lea.vmem %s110_s1, 128  ;;  %p150_p1 = scmp.lt.s32.totalorder %s110_s1, %s110_s1 }
   0x6   :  { %p146_p0 = scmp.ne.s32.totalorder %s110_s1, %s145_s25  ;;  %p151_p2 = scmp.lt.s32.totalorder %s145_s25, %s145_s25 }
   0x8   :  { %140 = vmatpush3.bf16.msra.mxu0 %v139_v7  ;;  %p152_p3 = por %p151_p2, %p150_p1 }
   0xa   :  { %p153_p4 = pnand %p152_p3, %p146_p0 }
   0xb   :  { %133 = vmatmul.mubr.msk.f32.vlgmr.msra.gmra.mrb[0].mxu0 %vm27_vm1, %v15_v8 }
  0xde   :  { %v97_v10 = vpop.f32.mrb[0].mxu0 }
  0xdf   :  { %v98_v11 = vadd.f32 %v117_v9, %v97_v10  ;;  %v134_v12 = vpop.f32.mrb[1].mxu0 }
  0xe1   :  { %102 = vst.msk [vmem:[#allocation2] sm:$0xff] %vm101_vm2, %v98_v11 }
  0xe2   :  { %156 = shalt.err (!%p153_p4)
}
  0xe3   :  { %s157_s27 = scalar_lea.hbm %s226_s3, 128 }
  0xe4   :  { %p158_p5 = scmp.ne.s32.totalorder %s226_s3, %s157_s27  ;;  %p161_p6 = scmp.lt.u32.totalorder %s157_s27, %s226_s3 }
  0xe6   :  { %p163_p7 = pnand %p161_p6, %p158_p5 }
  0xe8   :  { %166 = shalt.err (!%p163_p7)
}
  0xe9   :  { %112 = dma.vmem_to_hbm [thread:$0]  %s110_s1, 128, %s226_s3, [#allocation3]  }
  0xea   :  { %167 = dma.done.wait [#allocation3], 128  }
  0xeb   :  { %168 = vsyncadd [#allocation3], 4294967168 }
  0xec   :  { %116 = vsyncpa [#allocation3], 1 }

</bundles_post_ra>
